<compile_context>
chip_gen: v6e
topology: v6e:2x2x1
jax: 0.10.0
libtpu: 0.0.40
codegen_flags: <defaults>
</compile_context>

<pallas_src>
import functools

import jax
import jax.numpy as jnp
from jax import lax
from jax.experimental import pallas as pl
from jax.experimental.pallas import tpu as pltpu


def _value_net_kernel(x_ref, w1_ref, b1_ref, w2_ref, b2_ref, w3_ref, b3_ref, out_ref):
    # x_ref: [bb, in] (batch on sublanes); weights stay in PyTorch layout [out, in].
    x = x_ref[...]
    # h1 = relu(x @ W1^T + b1): contract x dim-1 with W1 dim-1 (no transpose needed).
    h1 = lax.dot_general(x, w1_ref[...], (((1,), (1,)), ((), ())),
                         preferred_element_type=jnp.float32) + b1_ref[...]
    h1 = jnp.maximum(h1, 0.0)                                   # [bb, hidden]
    h2 = lax.dot_general(h1, w2_ref[...], (((1,), (1,)), ((), ())),
                         preferred_element_type=jnp.float32) + b2_ref[...]
    h2 = jnp.maximum(h2, 0.0)                                   # [bb, half]
    # fc3 has one output feature: VPU multiply + cross-lane (XLU) reduction
    # avoids an N=1 MXU pass.
    y = jnp.sum(h2 * w3_ref[...], axis=1, keepdims=True) + b3_ref[0]
    out_ref[...] = y.astype(out_ref.dtype)                      # [bb, 1]


def _round_up(x, m):
    return ((x + m - 1) // m) * m


@functools.partial(jax.jit, static_argnames=("block_b",))
def value_network_forward(state, params, *, block_b=1024):
    """state: [B, input_size] f32, params in PyTorch layout -> [B, 1] f32."""
    w1, b1, w2, b2, w3, b3 = params       # w1:[H,I] b1:[H] w2:[H2,H] b2:[H2] w3:[1,H2] b3:[1]
    B, in_size = state.shape
    hidden = w1.shape[0]
    half = w2.shape[0]

    # Batch tile on the sublane axis: multiple of 128, capped at the padded batch.
    bb = max(128, min(_round_up(block_b, 128), _round_up(B, 128)))

    # --- VMEM accounting (f32, lane/sublane padded tiles) ---------------------
    def _tile_bytes(r, c):
        return _round_up(r, 8) * _round_up(c, 128) * 4

    weight_bytes = (_tile_bytes(hidden, in_size) + _tile_bytes(1, hidden)
                    + _tile_bytes(half, hidden) + _tile_bytes(1, half)
                    + _tile_bytes(1, half))          # single-buffered (Buffered(1))

    def _working_set(b):
        return (weight_bytes
                + 2 * _tile_bytes(b, in_size)        # double-buffered x tile
                + 2 * _tile_bytes(b, 1)              # double-buffered out tile
                + _tile_bytes(b, hidden) + _tile_bytes(b, half))   # h1 / h2

    budget = 48 << 20                                # headroom under v7x's 64 MiB VMEM
    while bb > 128 and _working_set(bb) > budget:
        bb -= 128

    vmem_limit = min(max(int(_working_set(bb) * 1.25) + (4 << 20), 16 << 20), 64 << 20)

    grid = (pl.cdiv(B, bb),)                         # ragged last tile: Pallas edge masking

    b1r = b1.reshape(1, hidden)                      # rows broadcast over the batch sublanes
    b2r = b2.reshape(1, half)
    w3r = w3.reshape(1, half)
    b3s = b3.reshape(1)

    # TODO(synk): optional bf16 weight path for v6e/v7x (halves weight VMEM/HBM,
    # ~2x MXU rate at production sizes) — kept f32 here to hold the 1e-5 check.
    in_specs = [
        pl.BlockSpec((bb, in_size), lambda i: (i, 0)),                      # x tile
        pl.BlockSpec((hidden, in_size), lambda i: (0, 0),
                     pipeline_mode=pl.Buffered(1)),                         # W1 (resident)
        pl.BlockSpec((1, hidden), lambda i: (0, 0),
                     pipeline_mode=pl.Buffered(1)),                         # b1 row
        pl.BlockSpec((half, hidden), lambda i: (0, 0),
                     pipeline_mode=pl.Buffered(1)),                         # W2 (resident)
        pl.BlockSpec((1, half), lambda i: (0, 0),
                     pipeline_mode=pl.Buffered(1)),                         # b2 row
        pl.BlockSpec((1, half), lambda i: (0, 0),
                     pipeline_mode=pl.Buffered(1)),                         # w3 row
        pl.BlockSpec(memory_space=pltpu.MemorySpace.SMEM),                  # b3 scalar
    ]
    out_specs = pl.BlockSpec((bb, 1), lambda i: (i, 0))

    flops = 2 * B * (in_size * hidden + hidden * half + half)
    bytes_accessed = 4 * (B * in_size + hidden * in_size + hidden
                          + half * hidden + 2 * half + 1 + B)

    out = pl.pallas_call(
        _value_net_kernel,
        out_shape=jax.ShapeDtypeStruct((B, 1), jnp.float32),
        grid=grid,
        in_specs=in_specs,
        out_specs=out_specs,
        compiler_params=pltpu.CompilerParams(
            dimension_semantics=("parallel",),       # batch axis shards across TCs on v7x
            vmem_limit_bytes=vmem_limit,
        ),
        cost_estimate=pl.CostEstimate(
            flops=flops, transcendentals=0, bytes_accessed=bytes_accessed),
    )(state, w1, b1r, w2, b2r, w3r, b3s)

    return out


def init_value_network_params(key, input_size, hidden_size):
    """PyTorch-layout params with nn.Linear-style U(-1/sqrt(fan_in), 1/sqrt(fan_in)) init."""
    half = hidden_size // 2
    k1, k2, k3, k4, k5, k6 = jax.random.split(key, 6)

    def uni(k, shape, fan_in):
        bound = 1.0 / jnp.sqrt(jnp.asarray(fan_in, jnp.float32))
        return jax.random.uniform(k, shape, jnp.float32, -bound, bound)

    w1 = uni(k1, (hidden_size, input_size), input_size)
    b1 = uni(k2, (hidden_size,), input_size)
    w2 = uni(k3, (half, hidden_size), hidden_size)
    b2 = uni(k4, (half,), hidden_size)
    w3 = uni(k5, (1, half), half)
    b3 = uni(k6, (1,), half)
    return (w1, b1, w2, b2, w3, b3)


def value_network_ref(state, params):
    """Pure-JAX reference matching the PyTorch forward pass."""
    w1, b1, w2, b2, w3, b3 = params
    x = jnp.maximum(state @ w1.T + b1, 0.0)
    x = jnp.maximum(x @ w2.T + b2, 0.0)
    return x @ w3.T + b3


if __name__ == "__main__":
    key = jax.random.PRNGKey(0)
    k_params, k_state = jax.random.split(key)

    batch = 8
    input_size = 16
    hidden_size = 32

    params = init_value_network_params(k_params, input_size, hidden_size)
    state = jax.random.normal(k_state, (batch, input_size), jnp.float32)

    out = value_network_forward(state, params)
    out = jax.block_until_ready(out)

    ref = value_network_ref(state, params)
    assert out.shape == (batch, 1)
    assert jnp.allclose(out, ref, atol=1e-5, rtol=1e-5)

    print("KERNEL_OK")
</pallas_src>

<mosaic_0001>
module attributes {stable_mosaic.version = 11 : i64} {
  func.func @_value_net_kernel(%arg0: i32, %arg1: memref<128x16xf32, #tpu.memory_space<vmem>>, %arg2: memref<32x16xf32, #tpu.memory_space<vmem>>, %arg3: memref<1x32xf32, #tpu.memory_space<vmem>>, %arg4: memref<16x32xf32, #tpu.memory_space<vmem>>, %arg5: memref<1x16xf32, #tpu.memory_space<vmem>>, %arg6: memref<1x16xf32, #tpu.memory_space<vmem>>, %arg7: memref<1xf32, #tpu.memory_space<smem>>, %arg8: memref<128x1xf32, #tpu.memory_space<vmem>>) attributes {dimension_semantics = [#tpu.dimension_semantics<parallel>], iteration_bounds = array<i64: 1>, scalar_prefetch = 0 : i64, scratch_operands = 0 : i64, tpu.core_type = #tpu.core_type<tc>, window_params = [{transform_indices = @transform_0, window_bounds = array<i64: 128, 16>}, {pipeline_mode = #tpu.pipeline_mode<synchronous>, transform_indices = @transform_1, window_bounds = array<i64: 32, 16>}, {pipeline_mode = #tpu.pipeline_mode<synchronous>, transform_indices = @transform_2, window_bounds = array<i64: 1, 32>}, {pipeline_mode = #tpu.pipeline_mode<synchronous>, transform_indices = @transform_3, window_bounds = array<i64: 16, 32>}, {pipeline_mode = #tpu.pipeline_mode<synchronous>, transform_indices = @transform_4, window_bounds = array<i64: 1, 16>}, {pipeline_mode = #tpu.pipeline_mode<synchronous>, transform_indices = @transform_5, window_bounds = array<i64: 1, 16>}, {transform_indices = @transform_6, window_bounds = array<i64: 1>}, {transform_indices = @transform_7, window_bounds = array<i64: 128, 1>}]} {
    %c0 = arith.constant 0 : index
    %c0_0 = arith.constant 0 : index
    %0 = vector.load %arg1[%c0, %c0_0] : memref<128x16xf32, #tpu.memory_space<vmem>>, vector<128x16xf32>
    %c0_1 = arith.constant 0 : index
    %c0_2 = arith.constant 0 : index
    %1 = vector.load %arg2[%c0_1, %c0_2] : memref<32x16xf32, #tpu.memory_space<vmem>>, vector<32x16xf32>
    %cst = arith.constant dense<0.000000e+00> : vector<128x32xf32>
    %2 = tpu.matmul %0, %1, %cst {dimension_numbers = #tpu.dot_dimension_numbers<[1], [1], [0], [0], [0, 0, 1, 0], [], []>} : vector<128x16xf32>, vector<32x16xf32>, vector<128x32xf32> -> vector<128x32xf32>
    %c0_3 = arith.constant 0 : index
    %c0_4 = arith.constant 0 : index
    %3 = vector.load %arg3[%c0_3, %c0_4] : memref<1x32xf32, #tpu.memory_space<vmem>>, vector<1x32xf32>
    %4 = vector.broadcast %3 : vector<1x32xf32> to vector<128x32xf32>
    %5 = arith.addf %2, %4 : vector<128x32xf32>
    %cst_5 = arith.constant 0.000000e+00 : f32
    %6 = vector.broadcast %cst_5 : f32 to vector<128x32xf32>
    %7 = arith.maximumf %5, %6 : vector<128x32xf32>
    %c0_6 = arith.constant 0 : index
    %c0_7 = arith.constant 0 : index
    %8 = vector.load %arg4[%c0_6, %c0_7] : memref<16x32xf32, #tpu.memory_space<vmem>>, vector<16x32xf32>
    %cst_8 = arith.constant dense<0.000000e+00> : vector<128x16xf32>
    %9 = tpu.matmul %7, %8, %cst_8 {dimension_numbers = #tpu.dot_dimension_numbers<[1], [1], [0], [0], [0, 0, 1, 0], [], []>} : vector<128x32xf32>, vector<16x32xf32>, vector<128x16xf32> -> vector<128x16xf32>
    %c0_9 = arith.constant 0 : index
    %c0_10 = arith.constant 0 : index
    %10 = vector.load %arg5[%c0_9, %c0_10] : memref<1x16xf32, #tpu.memory_space<vmem>>, vector<1x16xf32>
    %11 = vector.broadcast %10 : vector<1x16xf32> to vector<128x16xf32>
    %12 = arith.addf %9, %11 : vector<128x16xf32>
    %cst_11 = arith.constant 0.000000e+00 : f32
    %13 = vector.broadcast %cst_11 : f32 to vector<128x16xf32>
    %14 = arith.maximumf %12, %13 : vector<128x16xf32>
    %c0_12 = arith.constant 0 : index
    %c0_13 = arith.constant 0 : index
    %15 = vector.load %arg6[%c0_12, %c0_13] : memref<1x16xf32, #tpu.memory_space<vmem>>, vector<1x16xf32>
    %16 = vector.broadcast %15 : vector<1x16xf32> to vector<128x16xf32>
    %17 = arith.mulf %14, %16 : vector<128x16xf32>
    %cst_14 = arith.constant dense<0.000000e+00> : vector<128xf32>
    %18 = vector.multi_reduction <add>, %17, %cst_14 [1] : vector<128x16xf32> to vector<128xf32>
    %19 = vector.shape_cast %18 : vector<128xf32> to vector<128x1xf32>
    %c0_15 = arith.constant 0 : index
    %20 = memref.load %arg7[%c0_15] : memref<1xf32, #tpu.memory_space<smem>>
    %21 = vector.broadcast %20 : f32 to vector<128x1xf32>
    %22 = arith.addf %19, %21 : vector<128x1xf32>
    %c0_16 = arith.constant 0 : index
    %c0_17 = arith.constant 0 : index
    %23 = vector.load %arg8[%c0_16, %c0_17] : memref<128x1xf32, #tpu.memory_space<vmem>>, vector<128x1xf32>
    tpu.vector_store %arg8[%c0_16, %c0_17], %22 {strides = array<i32>} : memref<128x1xf32, #tpu.memory_space<vmem>>, vector<128x1xf32>,
    return
  }
  func.func @transform_0(%arg0: i32) -> (i32, i32) {
    %c0_i32 = arith.constant 0 : i32
    %c0_i32_0 = arith.constant 0 : i32
    return %arg0, %c0_i32 : i32, i32
  }
  func.func @transform_1(%arg0: i32) -> (i32, i32) {
    %c0_i32 = arith.constant 0 : i32
    %c0_i32_0 = arith.constant 0 : i32
    %c0_i32_1 = arith.constant 0 : i32
    return %c0_i32, %c0_i32_0 : i32, i32
  }
  func.func @transform_2(%arg0: i32) -> (i32, i32) {
    %c0_i32 = arith.constant 0 : i32
    %c0_i32_0 = arith.constant 0 : i32
    %c0_i32_1 = arith.constant 0 : i32
    return %c0_i32, %c0_i32_0 : i32, i32
  }
  func.func @transform_3(%arg0: i32) -> (i32, i32) {
    %c0_i32 = arith.constant 0 : i32
    %c0_i32_0 = arith.constant 0 : i32
    %c0_i32_1 = arith.constant 0 : i32
    return %c0_i32, %c0_i32_0 : i32, i32
  }
  func.func @transform_4(%arg0: i32) -> (i32, i32) {
    %c0_i32 = arith.constant 0 : i32
    %c0_i32_0 = arith.constant 0 : i32
    %c0_i32_1 = arith.constant 0 : i32
    return %c0_i32, %c0_i32_0 : i32, i32
  }
  func.func @transform_5(%arg0: i32) -> (i32, i32) {
    %c0_i32 = arith.constant 0 : i32
    %c0_i32_0 = arith.constant 0 : i32
    %c0_i32_1 = arith.constant 0 : i32
    return %c0_i32, %c0_i32_0 : i32, i32
  }
  func.func @transform_6(%arg0: i32) -> i32 {
    %c0_i32 = arith.constant 0 : i32
    %c0_i32_0 = arith.constant 0 : i32
    return %c0_i32 : i32
  }
  func.func @transform_7(%arg0: i32) -> (i32, i32) {
    %c0_i32 = arith.constant 0 : i32
    %c0_i32_0 = arith.constant 0 : i32
    return %arg0, %c0_i32 : i32, i32
  }
}

</mosaic_0001>

<bundles_post_ra>
// kernel: value_network_forward.1
= control target key start
LH: loop header
LB: loop body
LE: loop exit
PB: predicated region body
PF: predicated region fallthrough
CT: control target
= control target key end

     0   :  { %vm54_vm0 = vcmask 130048   ;;  %vm285_vm1 = vcmask 261120   ;;  %vm590_vm2 = vcmask 7168   ;;  %s1004_s0 = inlined_call_operand.vmem [shape: f32[8,16], index: 0, kind: input, shape index: {}]   ;;  %s1005_s1 = inlined_call_operand.vmem [shape: f32[32,16], index: 1, kind: input, shape index: {}]   ;;  %s1006_s2 = inlined_call_operand.vmem [shape: f32[1,32], index: 2, kind: input, shape index: {}]   ;;  %s1007_s3 = inlined_call_operand.vmem [shape: f32[16,32], index: 3, kind: input, shape index: {}]   ;;  %s1008_s4 = inlined_call_operand.vmem [shape: f32[1,16], index: 4, kind: input, shape index: {}]   ;;  %s1009_s5 = inlined_call_operand.vmem [shape: f32[1,16], index: 5, kind: input, shape index: {}]   ;;  %s1010_s6 = inlined_call_operand.<no memory space> [shape: f32[1], index: 6, kind: input, shape index: {}]   ;;  %s1011_s7 = inlined_call_operand.vmem [shape: f32[8,1], index: 7, kind: output, shape index: {}]  }
   0x1   :  { %v46_v0 = vld [vmem:[%s1005_s1 + $0x18] sm:$0xff]  ;;  %v45_v1 = vld [vmem:[%s1005_s1 + $0x10] sm:$0xff]  ;;  %v27_v2 = vld [vmem:[%s1004_s0] sm:$0xff] }
   0x2   :  { %727 = vmatprep.subr.msk.mxu0 %vm54_vm0, %v46_v0  ;;  %735 = vmatprep.mubr.msk.f32.mxu0 %vm54_vm0, %v27_v2  ;;  %v44_v3 = vld [vmem:[%s1005_s1 + $0x8] sm:$0xff]  ;;  %v43_v4 = vld [vmem:[%s1005_s1] sm:$0xff]  ;;  %v29_v6 = vld [vmem:[%s1004_s0 + $0x10] sm:$0xff] }
   0x3   :  { %728 = vmatpush3.xpose.msk.msra.mxu0 %vm54_vm0, %v46_v0  ;;  %v28_v5 = vld [vmem:[%s1004_s0 + $0x8] sm:$0xff]  ;;  %v30_v7 = vld [vmem:[%s1004_s0 + $0x18] sm:$0xff]  ;;  %v31_v8 = vld [vmem:[%s1004_s0 + $0x20] sm:$0xff] }
   0x4   :  { %729 = vmatprep.subr.msk.mxu0 %vm54_vm0, %v45_v1  ;;  %v32_v9 = vld [vmem:[%s1004_s0 + $0x28] sm:$0xff]  ;;  %v33_v10 = vld [vmem:[%s1004_s0 + $0x30] sm:$0xff]  ;;  %v34_v11 = vld [vmem:[%s1004_s0 + $0x38] sm:$0xff] }
   0x5   :  { %v35_v12 = vld [vmem:[%s1004_s0 + $0x40] sm:$0xff]  ;;  %v36_v13 = vld [vmem:[%s1004_s0 + $0x48] sm:$0xff]  ;;  %v37_v14 = vld [vmem:[%s1004_s0 + $0x50] sm:$0xff] }
   0x6   :  { %v38_v15 = vld [vmem:[%s1004_s0 + $0x58] sm:$0xff]  ;;  %v39_v16 = vld [vmem:[%s1004_s0 + $0x60] sm:$0xff]  ;;  %v40_v17 = vld [vmem:[%s1004_s0 + $0x68] sm:$0xff] }
   0x7   :  { %730 = vmatpush3.xpose.msk.msra.mxu0 %vm54_vm0, %v45_v1  ;;  %v41_v18 = vld [vmem:[%s1004_s0 + $0x70] sm:$0xff]  ;;  %v42_v19 = vld [vmem:[%s1004_s0 + $0x78] sm:$0xff]  ;;  %v277_v20 = vld [vmem:[%s1007_s3 + $0x8] sm:$0xff] }
   0x8   :  { %731 = vmatprep.subr.msk.mxu0 %vm54_vm0, %v44_v3  ;;  %759 = vmatprep.subr.msk.mxu1 %vm285_vm1, %v277_v20  ;;  %v276_v21 = vld [vmem:[%s1007_s3] sm:$0xff] }
   0x9   :  { %760 = vmatpush3.xpose.msk.msra.mxu1 %vm285_vm1, %v277_v20  ;;  %v648_v22 = vld [vmem:[%s1006_s2] ss:$0 sm:$0xff] }
   0xa   :  { %761 = vmatprep.subr.msk.mxu1 %vm285_vm1, %v276_v21 }
   0xb   :  { %732 = vmatpush3.xpose.msk.msra.mxu0 %vm54_vm0, %v44_v3 }
   0xc   :  { %733 = vmatprep.subr.msk.mxu0 %vm54_vm0, %v43_v4 }
   0xd   :  { %762 = vmatpush3.xpose.msk.msra.mxu1 %vm285_vm1, %v276_v21 }
   0xf   :  { %734 = vmatpush3.xpose.msk.msra.mxu0 %vm54_vm0, %v43_v4 }
  0x12   :  { %736 = vmatmul.mubr.msk.f32.vlgmr.msra.gmra.mxu0 %vm54_vm0, %v28_v5 }
  0x13   :  { %738 = vmatprep.mubr.msk.f32.mxu0 %vm54_vm0, %v29_v6 }
  0x16   :  { %739 = vmatmul.mubr.msk.f32.gmra.mxu0 %vm54_vm0, %v30_v7  ;;  %v943_v7 = vld [vmem:[%s1008_s4] ss:$0 sm:$0xff] }
  0x17   :  { %741 = vmatprep.mubr.msk.f32.mxu0 %vm54_vm0, %v31_v8 }
  0x1a   :  { %742 = vmatmul.mubr.msk.f32.gmra.mxu0 %vm54_vm0, %v32_v9 }
  0x1b   :  { %744 = vmatprep.mubr.msk.f32.mxu0 %vm54_vm0, %v33_v10 }
  0x1e   :  { %745 = vmatmul.mubr.msk.f32.gmra.mxu0 %vm54_vm0, %v34_v11  ;;  %v949_v11 = vld [vmem:[%s1009_s5] ss:$0 sm:$0xff] }
  0x1f   :  { %747 = vmatprep.mubr.msk.f32.mxu0 %vm54_vm0, %v35_v12 }
  0x22   :  { %748 = vmatmul.mubr.msk.f32.gmra.mxu0 %vm54_vm0, %v36_v13 }
  0x23   :  { %750 = vmatprep.mubr.msk.f32.mxu0 %vm54_vm0, %v37_v14 }
  0x26   :  { %751 = vmatmul.mubr.msk.f32.gmra.mxu0 %vm54_vm0, %v38_v15 }
  0x27   :  { %753 = vmatprep.mubr.msk.f32.mxu0 %vm54_vm0, %v39_v16 }
  0x2a   :  { %754 = vmatmul.mubr.msk.f32.gmra.mxu0 %vm54_vm0, %v40_v17 }
  0x2b   :  { %756 = vmatprep.mubr.msk.f32.mxu0 %vm54_vm0, %v41_v18 }
  0x2e   :  { %757 = vmatmul.mubr.msk.f32.gmra.mxu0 %vm54_vm0, %v42_v19 }
  0xd2   :  { %v737_v23 = vpop.f32.mrf.mxu0 }
  0xd3   :  { %v187_v24 = vadd.f32 %v737_v23, %v648_v22 }
  0xd4   :  { %v181_v25 = vpop.f32.mrf.mxu0 }
  0xd5   :  { %v182_v26 = vadd.f32 %v648_v22, %v181_v25  ;;  %v261_v29 = vmax.f32 %v187_v24, 0.0 }
  0xd6   :  { %v740_v27 = vpop.f32.mrf.mxu0 }
  0xd7   :  { %v260_v28 = vmax.f32 %v182_v26, 0.0  ;;  %v197_v30 = vadd.f32 %v740_v27, %v648_v22 }
  0xd8   :  { %v191_v31 = vpop.f32.mrf.mxu0 }
  0xd9   :  { %v192_v32 = vadd.f32 %v648_v22, %v191_v31  ;;  %763 = vmatprep.mubr.msk.f32.mxu1 %vm285_vm1, %v260_v28  ;;  %v263_v36 = vmax.f32 %v197_v30, 0.0 }
  0xda   :  { %v743_v33 = vpop.f32.mrf.mxu0  ;;  %764 = vmatmul.mubr.msk.f32.vlgmr.msra.gmra.mxu1 %vm285_vm1, %v261_v29 }
  0xdb   :  { %v262_v34 = vmax.f32 %v192_v32, 0.0  ;;  %v207_v35 = vadd.f32 %v743_v33, %v648_v22 }
  0xdc   :  { %v201_v37 = vpop.f32.mrf.mxu0 }
  0xdd   :  { %v202_v38 = vadd.f32 %v648_v22, %v201_v37  ;;  %766 = vmatprep.mubr.msk.f32.mxu1 %vm285_vm1, %v262_v34  ;;  %v265_v39 = vmax.f32 %v207_v35, 0.0 }
  0xde   :  { %v746_v40 = vpop.f32.mrf.mxu0  ;;  %767 = vmatmul.mubr.msk.f32.gmra.mxu1 %vm285_vm1, %v263_v36 }
  0xdf   :  { %v264_v41 = vmax.f32 %v202_v38, 0.0  ;;  %v217_v42 = vadd.f32 %v746_v40, %v648_v22 }
  0xe0   :  { %v211_v43 = vpop.f32.mrf.mxu0 }
  0xe1   :  { %v212_v44 = vadd.f32 %v648_v22, %v211_v43  ;;  %769 = vmatprep.mubr.msk.f32.mxu1 %vm285_vm1, %v264_v41  ;;  %v267_v45 = vmax.f32 %v217_v42, 0.0 }
  0xe2   :  { %v749_v46 = vpop.f32.mrf.mxu0  ;;  %770 = vmatmul.mubr.msk.f32.gmra.mxu1 %vm285_vm1, %v265_v39 }
  0xe3   :  { %v266_v47 = vmax.f32 %v212_v44, 0.0  ;;  %v227_v48 = vadd.f32 %v749_v46, %v648_v22 }
  0xe4   :  { %v221_v49 = vpop.f32.mrf.mxu0 }
  0xe5   :  { %v222_v50 = vadd.f32 %v648_v22, %v221_v49  ;;  %772 = vmatprep.mubr.msk.f32.mxu1 %vm285_vm1, %v266_v47  ;;  %v269_v51 = vmax.f32 %v227_v48, 0.0 }
  0xe6   :  { %v752_v52 = vpop.f32.mrf.mxu0  ;;  %773 = vmatmul.mubr.msk.f32.gmra.mxu1 %vm285_vm1, %v267_v45 }
  0xe7   :  { %v268_v53 = vmax.f32 %v222_v50, 0.0  ;;  %v237_v54 = vadd.f32 %v752_v52, %v648_v22 }
  0xe8   :  { %v231_v55 = vpop.f32.mrf.mxu0 }
  0xe9   :  { %v232_v56 = vadd.f32 %v648_v22, %v231_v55  ;;  %775 = vmatprep.mubr.msk.f32.mxu1 %vm285_vm1, %v268_v53  ;;  %v271_v57 = vmax.f32 %v237_v54, 0.0 }
  0xea   :  { %v755_v58 = vpop.f32.mrf.mxu0  ;;  %776 = vmatmul.mubr.msk.f32.gmra.mxu1 %vm285_vm1, %v269_v51 }
  0xeb   :  { %v270_v59 = vmax.f32 %v232_v56, 0.0  ;;  %v247_v60 = vadd.f32 %v755_v58, %v648_v22 }
  0xec   :  { %v241_v61 = vpop.f32.mrf.mxu0 }
  0xed   :  { %v242_v62 = vadd.f32 %v648_v22, %v241_v61  ;;  %778 = vmatprep.mubr.msk.f32.mxu1 %vm285_vm1, %v270_v59  ;;  %v273_v63 = vmax.f32 %v247_v60, 0.0 }
  0xee   :  { %v758_v0 = vpop.f32.mrf.mxu0  ;;  %779 = vmatmul.mubr.msk.f32.gmra.mxu1 %vm285_vm1, %v271_v57 }
  0xef   :  { %v272_v1 = vmax.f32 %v242_v62, 0.0  ;;  %v257_v2 = vadd.f32 %v758_v0, %v648_v22 }
  0xf0   :  { %v251_v3 = vpop.f32.mrf.mxu0 }
  0xf1   :  { %v252_v4 = vadd.f32 %v648_v22, %v251_v3  ;;  %781 = vmatprep.mubr.msk.f32.mxu1 %vm285_vm1, %v272_v1  ;;  %v275_v5 = vmax.f32 %v257_v2, 0.0 }
  0xf2   :  { %782 = vmatmul.mubr.msk.f32.gmra.mxu1 %vm285_vm1, %v273_v63 }
  0xf3   :  { %v274_v6 = vmax.f32 %v252_v4, 0.0 }
  0xf5   :  { %784 = vmatprep.mubr.msk.f32.mxu1 %vm285_vm1, %v274_v6 }
  0xf6   :  { %785 = vmatmul.mubr.msk.f32.gmra.mxu1 %vm285_vm1, %v275_v5 }
 0x19a   :  { %v765_v8 = vpop.f32.mrf.mxu1 }
 0x19b   :  { %v412_v9 = vadd.f32 %v765_v8, %v943_v7 }
 0x19c   :  { %v406_v10 = vpop.f32.mrf.mxu1 }
 0x19d   :  { %v486_v12 = vmax.f32 %v412_v9, 0.0  ;;  %v407_v13 = vadd.f32 %v943_v7, %v406_v10 }
 0x19e   :  { %v768_v14 = vpop.f32.mrf.mxu1 }
 0x19f   :  { %v485_v15 = vmax.f32 %v407_v13, 0.0  ;;  %v422_v16 = vadd.f32 %v768_v14, %v943_v7  ;;  %v509_v17 = vmul.f32 %v949_v11, %v486_v12 }
 0x1a0   :  { %v416_v18 = vpop.f32.mrf.mxu1 }
 0x1a1   :  { %v488_v19 = vmax.f32 %v422_v16, 0.0  ;;  %v417_v20 = vadd.f32 %v943_v7, %v416_v18  ;;  %v527_v21 = vsel %vm54_vm0, %v509_v17, 0.0  ;;  %v508_v22 = vmul.f32 %v949_v11, %v485_v15 }
 0x1a2   :  { %528 = vadd.xlane.f32.xlu0 %v527_v21  ;;  %v771_v23 = vpop.f32.mrf.mxu1 }
 0x1a3   :  { %v487_v24 = vmax.f32 %v417_v20, 0.0  ;;  %v432_v25 = vadd.f32 %v771_v23, %v943_v7  ;;  %v511_v26 = vmul.f32 %v949_v11, %v488_v19  ;;  %v524_v28 = vsel %vm54_vm0, %v508_v22, 0.0 }
 0x1a4   :  { %v426_v27 = vpop.f32.mrf.mxu1 }
 0x1a5   :  { %v490_v29 = vmax.f32 %v432_v25, 0.0  ;;  %v427_v30 = vadd.f32 %v943_v7, %v426_v27  ;;  %v533_v31 = vsel %vm54_vm0, %v511_v26, 0.0  ;;  %v510_v32 = vmul.f32 %v949_v11, %v487_v24 }
 0x1a6   :  { %534 = vadd.xlane.f32.xlu1 %v533_v31  ;;  %v774_v33 = vpop.f32.mrf.mxu1  ;;  %525 = vadd.xlane.f32.xlu0 %v524_v28  ;;  %v573_v26 = vstv %s1010_s6 }
 0x1a7   :  { %v489_v34 = vmax.f32 %v427_v30, 0.0  ;;  %v442_v35 = vadd.f32 %v774_v33, %v943_v7  ;;  %v530_v37 = vsel %vm54_vm0, %v510_v32, 0.0  ;;  %v513_v41 = vmul.f32 %v949_v11, %v490_v29 }
 0x1a8   :  { %v436_v36 = vpop.f32.mrf.mxu1 }
 0x1a9   :  { %v492_v38 = vmax.f32 %v442_v35, 0.0  ;;  %v437_v39 = vadd.f32 %v943_v7, %v436_v36  ;;  %v512_v40 = vmul.f32 %v949_v11, %v489_v34  ;;  %v539_v50 = vsel %vm54_vm0, %v513_v41, 0.0 }
 0x1aa   :  { %v777_v42 = vpop.f32.mrf.mxu1  ;;  %531 = vadd.xlane.f32.xlu1 %v530_v37 }
 0x1ab   :  { %v491_v43 = vmax.f32 %v437_v39, 0.0  ;;  %v452_v44 = vadd.f32 %v777_v42, %v943_v7  ;;  %v536_v45 = vsel %vm54_vm0, %v512_v40, 0.0  ;;  %v515_v47 = vmul.f32 %v949_v11, %v492_v38 }
 0x1ac   :  { %v446_v46 = vpop.f32.mrf.mxu1  ;;  %537 = vadd.xlane.f32.xlu0 %v536_v45 }
 0x1ad   :  { %v494_v48 = vmax.f32 %v452_v44, 0.0  ;;  %v447_v49 = vadd.f32 %v943_v7, %v446_v46  ;;  %v514_v51 = vmul.f32 %v949_v11, %v491_v43  ;;  %v545_v57 = vsel %vm54_vm0, %v515_v47, 0.0 }
 0x1ae   :  { %v780_v52 = vpop.f32.mrf.mxu1  ;;  %540 = vadd.xlane.f32.xlu1 %v539_v50 }
 0x1af   :  { %v493_v53 = vmax.f32 %v447_v49, 0.0  ;;  %v462_v54 = vadd.f32 %v780_v52, %v943_v7  ;;  %v542_v55 = vsel %vm54_vm0, %v514_v51, 0.0  ;;  %v517_v61 = vmul.f32 %v949_v11, %v494_v48 }
 0x1b0   :  { %v456_v56 = vpop.f32.mrf.mxu1  ;;  %543 = vadd.xlane.f32.xlu0 %v542_v55 }
 0x1b1   :  { %v496_v58 = vmax.f32 %v462_v54, 0.0  ;;  %v457_v59 = vadd.f32 %v943_v7, %v456_v56  ;;  %v516_v60 = vmul.f32 %v949_v11, %v493_v53  ;;  %v551_v6 = vsel %vm54_vm0, %v517_v61, 0.0 }
 0x1b2   :  { %v783_v62 = vpop.f32.mrf.mxu1  ;;  %546 = vadd.xlane.f32.xlu1 %v545_v57 }
 0x1b3   :  { %v495_v63 = vmax.f32 %v457_v59, 0.0  ;;  %v472_v0 = vadd.f32 %v783_v62, %v943_v7  ;;  %v548_v1 = vsel %vm54_vm0, %v516_v60, 0.0  ;;  %v519_v3 = vmul.f32 %v949_v11, %v496_v58 }
 0x1b4   :  { %v466_v2 = vpop.f32.mrf.mxu1  ;;  %549 = vadd.xlane.f32.xlu0 %v548_v1 }
 0x1b5   :  { %v498_v4 = vmax.f32 %v472_v0, 0.0  ;;  %v467_v5 = vadd.f32 %v943_v7, %v466_v2  ;;  %v518_v8 = vmul.f32 %v949_v11, %v495_v63  ;;  %v557_v15 = vsel %vm54_vm0, %v519_v3, 0.0 }
 0x1b6   :  { %v786_v9 = vpop.f32.mrf.mxu1  ;;  %552 = vadd.xlane.f32.xlu1 %v551_v6 }
 0x1b7   :  { %v497_v10 = vmax.f32 %v467_v5, 0.0  ;;  %v482_v12 = vadd.f32 %v786_v9, %v943_v7  ;;  %v554_v13 = vsel %vm54_vm0, %v518_v8, 0.0  ;;  %v521_v19 = vmul.f32 %v949_v11, %v498_v4 }
 0x1b8   :  { %v476_v14 = vpop.f32.mrf.mxu1  ;;  %555 = vadd.xlane.f32.xlu0 %v554_v13 }
 0x1b9   :  { %v500_v16 = vmax.f32 %v482_v12, 0.0  ;;  %v477_v17 = vadd.f32 %v943_v7, %v476_v14  ;;  %v520_v18 = vmul.f32 %v949_v11, %v497_v10  ;;  %v563_v22 = vsel %vm54_vm0, %v521_v19, 0.0 }
 0x1ba   :  { %558 = vadd.xlane.f32.xlu1 %v557_v15 }
 0x1bb   :  { %v499_v20 = vmax.f32 %v477_v17, 0.0  ;;  %v560_v21 = vsel %vm54_vm0, %v520_v18, 0.0  ;;  %v523_v24 = vmul.f32 %v949_v11, %v500_v16 }
 0x1bc   :  { %561 = vadd.xlane.f32.xlu0 %v560_v21 }
 0x1bd   :  { %v522_v23 = vmul.f32 %v949_v11, %v499_v20  ;;  %v569_v7 = vsel %vm54_vm0, %v523_v24, 0.0 }
 0x1be   :  { %564 = vadd.xlane.f32.xlu1 %v563_v22 }
 0x1bf   :  { %v566_v25 = vsel %vm54_vm0, %v522_v23, 0.0 }
 0x1c0   :  { %567 = vadd.xlane.f32.xlu0 %v566_v25 }
 0x1c2   :  { %570 = vadd.xlane.f32.xlu1 %v569_v7 }
 0x22b   :  { %v529_v27 = vpop.xlane.xlu0 %528 }
 0x22f   :  { %v535_v28 = vpop.xlane.xlu1 %534  ;;  %v526_v29 = vpop.xlane.xlu0 %525 }
 0x230   :  { %v574_v30 = vadd.f32 %v573_v26, %v526_v29 }
 0x232   :  { %591 = vst.msk [vmem:[#allocation3] sm:$0xff] %vm590_vm2, %v574_v30 }
 0x233   :  { %v532_v31 = vpop.xlane.xlu1 %531 }
 0x235   :  { %v538_v32 = vpop.xlane.xlu0 %537 }
 0x237   :  { %v541_v11 = vpop.xlane.xlu1 %540 }
 0x239   :  { %v637_v33 = vld [vmem:[#allocation3] sm:$0xff]  ;;  %v544_v34 = vpop.xlane.xlu0 %543 }
 0x23a   :  { %638 = vst [vmem:[%s1011_s7] sm:$0xff] %v637_v33 }
 0x23b   :  { %v547_v35 = vpop.xlane.xlu1 %546 }
 0x23d   :  { %v550_v36 = vpop.xlane.xlu0 %549 }
 0x23f   :  { %v553_v37 = vpop.xlane.xlu1 %552 }
 0x241   :  { %v556_v38 = vpop.xlane.xlu0 %555 }
 0x243   :  { %v559_v39 = vpop.xlane.xlu1 %558 }
 0x245   :  { %v562_v40 = vpop.xlane.xlu0 %561 }
 0x247   :  { %v565_v41 = vpop.xlane.xlu1 %564 }
 0x249   :  { %v568_v42 = vpop.xlane.xlu0 %567 }
 0x24b   :  { %v571_v43 = vpop.xlane.xlu1 %570 }

</bundles_post_ra>
